<compile_context>
chip_gen: v5e
topology: v5e:2x2
jax: 0.10.0
libtpu: 0.0.40
codegen_flags: <defaults>
</compile_context>

<pallas_src>
import jax
import jax.numpy as jnp
from jax.experimental import pallas as pl
from jax.experimental.pallas import tpu as pltpu


def _round_up(x, m):
    return ((x + m - 1) // m) * m


def _vmem_capacity_bytes():
    """Physical per-core VMEM (v5e/v6e: 128 MiB, v7x: 64 MiB); safe fallback."""
    try:
        info = pltpu.get_tpu_info()
        cap = getattr(info, "vmem_capacity_bytes", None)
        if cap:
            return int(cap)
    except Exception:
        pass
    return 64 * 1024 * 1024  # conservative: v7x per-TensorCore VMEM


def _choose_tiles(B, N, Fx, Fp, adj_bytes, x_bytes, w_bytes, out_bytes,
                  weight_in_kernel, budget):
    """Pick (batch_tile, row_tile) so double-buffered blocks *plus* in-kernel
    f32 temporaries fit inside `budget` bytes."""
    f32b = 4
    # Resident operands (constant index maps -> never re-DMA'd, but Pallas
    # still allocates 2 buffers each; both buffers are counted here).
    resident = 2 * Fp * f32b                                   # bias
    if weight_in_kernel:
        resident += 2 * Fx * Fp * w_bytes                      # (Fin, Fp) weight
    # Per batch inside a block: text/proj block (double buffered).
    per_batch = 2 * N * Fx * x_bytes
    # Per (batch, row) inside a block: adj + out blocks (double buffered) plus
    # f32 temporaries (adj promotion for dot/denom, dot result + reshape copy).
    per_row = 2 * N * adj_bytes + 2 * Fp * out_bytes + N * f32b + 2 * Fp * f32b
    if weight_in_kernel:
        per_row += 2 * Fx * f32b                               # tw intermediate

    row_align = 16 if adj_bytes < 4 else 8                     # bf16 packs 2 rows/sublane

    avail = budget - resident
    if avail <= per_batch + row_align * per_row:
        # Graceful floor. Very large feature dims would need an Fp/K grid axis
        # to do better; the wrapper-projection fallback in the caller already
        # removes the weight from the kernel in that regime.
        return 1, min(N, row_align)

    avail -= per_batch
    row_tile = min(N, 1024, (avail // per_row) // row_align * row_align)
    if row_tile < N:
        return 1, max(row_align, row_tile)

    # A whole graph fits in one row tile: pack several batches per grid step
    # to amortize the ~0.35us/step overhead and fill MXU rows.
    per_graph = per_batch + N * per_row
    batch_tile = int(max(1, min(B, (budget - resident) // per_graph, 8)))
    return batch_tile, N


def _ensure_two_steps(B, N, Bt, Tn, row_align):
    """v7x has 2 TensorCores that shard 'parallel' grid axes; avoid a 1-step
    grid (one core idle) whenever the problem can be split.  Costs at most one
    extra ~0.35us step on the single-core v5e/v6e."""
    if pl.cdiv(B, Bt) * pl.cdiv(N, Tn) >= 2:
        return Bt, Tn
    if B >= 2:
        return (B + 1) // 2, Tn
    if Tn >= N and N >= 2 * row_align:
        return Bt, max(row_align, _round_up((N + 1) // 2, row_align))
    return Bt, Tn


def _gcn_kernel_premul(adj_ref, x_ref, b_ref, out_ref):
    """x already holds text @ W.T (projection hoisted to the wrapper)."""
    adj = adj_ref[...]                                          # (Bt, Tn, N)
    hidden = jnp.einsum("brn,bnf->brf", adj, x_ref[...],
                        preferred_element_type=jnp.float32)     # (Bt, Tn, Fp)
    hidden = hidden + b_ref[...].reshape(1, 1, -1)
    # Row sums accumulate in f32 straight from the stored dtype (no explicit
    # f32 copy of the adj block); XLU reduce hides under the MXU dots.
    denom = jnp.sum(adj, axis=2, dtype=jnp.float32, keepdims=True) + 1.0
    # NOTE: when N % Tn != 0 the padded edge rows feed garbage into denom /
    # reciprocal; those rows are masked on store, so live rows stay correct.
    out_ref[...] = (hidden * pl.reciprocal(denom, approx=False)).astype(out_ref.dtype)


def _gcn_kernel_proj(adj_ref, text_ref, w_ref, b_ref, out_ref):
    """Projection inside the kernel (Fin <= padded Fout): (adj @ text) @ W."""
    adj = adj_ref[...]                                          # (Bt, Tn, N)
    tw = jnp.einsum("brn,bnf->brf", adj, text_ref[...],
                    preferred_element_type=jnp.float32)         # (Bt, Tn, Fin) f32
    w = w_ref[...]                                              # (Fin, Fp)
    bt, tn, fin = tw.shape
    hidden = jnp.dot(tw.reshape(bt * tn, fin).astype(w.dtype), w,
                     preferred_element_type=jnp.float32).reshape(bt, tn, -1)
    hidden = hidden + b_ref[...].reshape(1, 1, -1)
    denom = jnp.sum(adj, axis=2, dtype=jnp.float32, keepdims=True) + 1.0
    out_ref[...] = (hidden * pl.reciprocal(denom, approx=False)).astype(out_ref.dtype)


def graph_convolution(text, adj, weight, bias, *, adj_bf16=False,
                      use_bf16_mxu=False, batch_tile=None, row_tile=None):
    """GCN forward: ((adj @ text) @ W.T + b) / (adj.sum(-1, keepdims=True) + 1).

    text: (B, N, Fin); adj: (B, N, N); weight: (Fout, Fin); bias: (Fout,).
    adj_bf16:     store adjacency as bf16 (exact only for 0/1 / small-int adj).
    use_bf16_mxu: bf16 x bf16 MXU dots with f32 accumulation (~1e-3 rel error).
    """
    B, N, Fin = text.shape
    Fout = weight.shape[0]
    f32 = jnp.float32

    # Lane-dense output feature dim (multiple of 128); sliced off at the end.
    Fp = max(128, _round_up(Fout, 128))

    adj_dtype = jnp.bfloat16 if (adj_bf16 or use_bf16_mxu) else f32
    x_dtype = jnp.bfloat16 if use_bf16_mxu else f32
    adj_bytes = jnp.dtype(adj_dtype).itemsize
    x_bytes = jnp.dtype(x_dtype).itemsize
    out_dtype = text.dtype
    out_bytes = jnp.dtype(out_dtype).itemsize

    # Generation-aware VMEM sizing (v7x: 64 MiB physical, v5e/v6e: 128 MiB).
    cap = _vmem_capacity_bytes()
    vmem_limit = min((cap * 3) // 4, 112 * 1024 * 1024)
    budget = vmem_limit - 6 * 1024 * 1024       # headroom for compiler scratch

    # Associativity: project before the adj contraction when it shrinks the
    # feature dim, or when the resident weight would not fit comfortably in
    # VMEM.  In both cases the projection runs ONCE in the wrapper (plain XLA
    # matmul) instead of once per adj row tile inside the kernel.
    project_in_wrapper = (Fp < Fin) or (2 * Fin * Fp * x_bytes > budget // 2)

    adj_in = adj.astype(adj_dtype)
    b_p = jnp.zeros((1, Fp), f32).at[:, :Fout].set(bias.reshape(1, Fout).astype(f32))

    if project_in_wrapper:
        w_t = jnp.zeros((Fin, Fp), f32).at[:, :Fout].set(weight.T.astype(f32))
        x_in = jnp.einsum("bnf,fo->bno", text.astype(f32), w_t,
                          precision=jax.lax.Precision.HIGHEST).astype(x_dtype)
        Fx = Fp
        kernel = _gcn_kernel_premul
    else:
        x_in = text.astype(x_dtype)
        w_t = jnp.zeros((Fin, Fp), x_dtype).at[:, :Fout].set(weight.T.astype(x_dtype))
        Fx = Fin
        kernel = _gcn_kernel_proj

    Bt, Tn = _choose_tiles(B, N, Fx, Fp, adj_bytes, x_bytes, x_bytes, out_bytes,
                           weight_in_kernel=not project_in_wrapper, budget=budget)
    if batch_tile is not None:
        Bt = max(1, min(int(batch_tile), B))
    if row_tile is not None:
        Tn = max(1, min(int(row_tile), N))
        if Tn < N:
            Tn = max(8, (Tn // 8) * 8)
    row_align = 16 if adj_bytes < 4 else 8
    Bt, Tn = _ensure_two_steps(B, N, Bt, Tn, row_align)

    grid = (pl.cdiv(B, Bt), pl.cdiv(N, Tn))

    in_specs = [
        pl.BlockSpec((Bt, Tn, N), lambda b, r: (b, r, 0)),      # adj row slab
        pl.BlockSpec((Bt, N, Fx), lambda b, r: (b, 0, 0)),      # text / proj (full rows)
    ]
    operands = [adj_in, x_in]
    if not project_in_wrapper:
        # Constant index map -> never re-DMA'd across the grid; its two
        # pipeline buffers are accounted for in the VMEM budget above.
        in_specs.append(pl.BlockSpec((Fin, Fp), lambda b, r: (0, 0)))
        operands.append(w_t)
    in_specs.append(pl.BlockSpec((1, Fp), lambda b, r: (0, 0)))  # bias (shared)
    operands.append(b_p)

    out_padded = pl.pallas_call(
        kernel,
        out_shape=jax.ShapeDtypeStruct((B, N, Fp), out_dtype),
        grid_spec=pltpu.PrefetchScalarGridSpec(
            num_scalar_prefetch=0,
            grid=grid,
            in_specs=in_specs,
            out_specs=pl.BlockSpec((Bt, Tn, Fp), lambda b, r: (b, r, 0)),
        ),
        compiler_params=pltpu.CompilerParams(
            dimension_semantics=("parallel", "parallel"),
            vmem_limit_bytes=vmem_limit,
        ),
    )(*operands)

    return out_padded[..., :Fout]


def graph_convolution_ref(text, adj, weight, bias):
    tw = jnp.einsum("bij,bjf->bif", adj, text)
    hidden = jnp.einsum("bif,of->bio", tw, weight) + bias
    denom = jnp.sum(adj, axis=2, keepdims=True) + 1.0
    return hidden / denom


if __name__ == "__main__":
    key = jax.random.PRNGKey(0)

    def make_inputs(k, B, N, Fin, Fout):
        k_text, k_adj, k_w, k_b = jax.random.split(k, 4)
        text = jax.random.normal(k_text, (B, N, Fin), dtype=jnp.float32)
        adj = (jax.random.uniform(k_adj, (B, N, N)) > 0.5).astype(jnp.float32)
        bound = 1.0 / float(Fin) ** 0.5   # nn.Linear-style init
        weight = jax.random.uniform(k_w, (Fout, Fin), minval=-bound, maxval=bound,
                                    dtype=jnp.float32)
        bias = jax.random.uniform(k_b, (Fout,), minval=-bound, maxval=bound,
                                  dtype=jnp.float32)
        return text, adj, weight, bias

    k1, k2, k3 = jax.random.split(key, 3)

    # 1) In-kernel projection path (Fin <= padded Fout); bf16 adjacency is
    #    exact for the 0/1 adjacency used here.
    text, adj, weight, bias = make_inputs(k1, 2, 16, 32, 32)
    out = jax.block_until_ready(graph_convolution(text, adj, weight, bias,
                                                  adj_bf16=True))
    ref = graph_convolution_ref(text, adj, weight, bias)
    assert out.shape == ref.shape
    assert jnp.allclose(out, ref, atol=1e-5, rtol=1e-5)

    # 2) Wrapper-projection path (padded Fout < Fin): projection hoisted out of
    #    the kernel, no per-row-tile recompute.
    text, adj, weight, bias = make_inputs(k2, 2, 16, 256, 32)
    out = jax.block_until_ready(graph_convolution(text, adj, weight, bias,
                                                  adj_bf16=True))
    ref = graph_convolution_ref(text, adj, weight, bias)
    assert jnp.allclose(out, ref, atol=1e-5, rtol=1e-5)

    # 3) Opt-in bf16 MXU path (looser tolerance by design).
    text, adj, weight, bias = make_inputs(k3, 2, 16, 32, 32)
    out = jax.block_until_ready(graph_convolution(text, adj, weight, bias,
                                                  use_bf16_mxu=True))
    ref = graph_convolution_ref(text, adj, weight, bias)
    assert jnp.allclose(out, ref, atol=5e-2, rtol=5e-2)

    print("KERNEL_OK")
</pallas_src>

<mosaic_0001>
module attributes {stable_mosaic.version = 11 : i64} {
  func.func @_gcn_kernel_proj(%arg0: i32, %arg1: i32, %arg2: memref<1x16x16xbf16, #tpu.memory_space<vmem>>, %arg3: memref<1x16x32xf32, #tpu.memory_space<vmem>>, %arg4: memref<32x128xf32, #tpu.memory_space<vmem>>, %arg5: memref<1x128xf32, #tpu.memory_space<vmem>>, %arg6: memref<1x16x128xf32, #tpu.memory_space<vmem>>) attributes {dimension_semantics = [#tpu.dimension_semantics<parallel>, #tpu.dimension_semantics<parallel>], iteration_bounds = array<i64: 2, 1>, scalar_prefetch = 0 : i64, scratch_operands = 0 : i64, tpu.core_type = #tpu.core_type<tc>, window_params = [{transform_indices = @transform_0, window_bounds = array<i64: 1, 16, 16>}, {transform_indices = @transform_1, window_bounds = array<i64: 1, 16, 32>}, {pipeline_mode = #tpu.pipeline_mode<synchronous>, transform_indices = @transform_2, window_bounds = array<i64: 32, 128>}, {pipeline_mode = #tpu.pipeline_mode<synchronous>, transform_indices = @transform_3, window_bounds = array<i64: 1, 128>}, {transform_indices = @transform_4, window_bounds = array<i64: 1, 16, 128>}]} {
    %c0 = arith.constant 0 : index
    %c0_0 = arith.constant 0 : index
    %c0_1 = arith.constant 0 : index
    %0 = vector.load %arg2[%c0, %c0_0, %c0_1] : memref<1x16x16xbf16, #tpu.memory_space<vmem>>, vector<1x16x16xbf16>
    %c0_2 = arith.constant 0 : index
    %c0_3 = arith.constant 0 : index
    %c0_4 = arith.constant 0 : index
    %1 = vector.load %arg3[%c0_2, %c0_3, %c0_4] : memref<1x16x32xf32, #tpu.memory_space<vmem>>, vector<1x16x32xf32>
    "tpu.trace_start"() <{level = 10 : i32, message = "brn,bnf->brf"}> : () -> ()
    %cst = arith.constant dense<0.000000e+00> : vector<1x16x32xf32>
    %2 = tpu.matmul %0, %1, %cst {dimension_numbers = #tpu.dot_dimension_numbers<[2], [1], [1], [2], [0, 0, 0, 1, 1, 2], [0], [0]>} : vector<1x16x16xbf16>, vector<1x16x32xf32>, vector<1x16x32xf32> -> vector<1x16x32xf32>
    "tpu.trace_stop"() : () -> ()
    %c0_5 = arith.constant 0 : index
    %c0_6 = arith.constant 0 : index
    %3 = vector.load %arg4[%c0_5, %c0_6] : memref<32x128xf32, #tpu.memory_space<vmem>>, vector<32x128xf32>
    %4 = vector.shape_cast %2 : vector<1x16x32xf32> to vector<16x32xf32>
    %cst_7 = arith.constant dense<0.000000e+00> : vector<16x128xf32>
    %5 = tpu.matmul %4, %3, %cst_7 {dimension_numbers = #tpu.dot_dimension_numbers<[1], [0], [0], [1], [0, 0, 1, 1], [], []>} : vector<16x32xf32>, vector<32x128xf32>, vector<16x128xf32> -> vector<16x128xf32>
    %6 = vector.shape_cast %5 : vector<16x128xf32> to vector<1x16x128xf32>
    %c0_8 = arith.constant 0 : index
    %c0_9 = arith.constant 0 : index
    %7 = vector.load %arg5[%c0_8, %c0_9] : memref<1x128xf32, #tpu.memory_space<vmem>>, vector<1x128xf32>
    %8 = vector.shape_cast %7 : vector<1x128xf32> to vector<1x1x128xf32>
    %9 = vector.broadcast %8 : vector<1x1x128xf32> to vector<1x16x128xf32>
    %10 = arith.addf %6, %9 : vector<1x16x128xf32>
    %11 = arith.extf %0 : vector<1x16x16xbf16> to vector<1x16x16xf32>
    %cst_10 = arith.constant dense<0.000000e+00> : vector<1x16xf32>
    %12 = vector.multi_reduction <add>, %11, %cst_10 [2] : vector<1x16x16xf32> to vector<1x16xf32>
    %13 = vector.shape_cast %12 : vector<1x16xf32> to vector<1x16x1xf32>
    %cst_11 = arith.constant 1.000000e+00 : f32
    %14 = vector.broadcast %cst_11 : f32 to vector<1x16x1xf32>
    %15 = arith.addf %13, %14 : vector<1x16x1xf32>
    %16 = tpu.reciprocal %15 : vector<1x16x1xf32> -> vector<1x16x1xf32>
    %17 = vector.broadcast %16 : vector<1x16x1xf32> to vector<1x16x128xf32>
    %18 = arith.mulf %10, %17 : vector<1x16x128xf32>
    %c0_12 = arith.constant 0 : index
    %c0_13 = arith.constant 0 : index
    %c0_14 = arith.constant 0 : index
    %19 = vector.load %arg6[%c0_12, %c0_13, %c0_14] : memref<1x16x128xf32, #tpu.memory_space<vmem>>, vector<1x16x128xf32>
    tpu.vector_store %arg6[%c0_12, %c0_13, %c0_14], %18 {strides = array<i32>} : memref<1x16x128xf32, #tpu.memory_space<vmem>>, vector<1x16x128xf32>,
    return
  }
  func.func @transform_0(%arg0: i32, %arg1: i32) -> (i32, i32, i32) {
    %c0_i32 = arith.constant 0 : i32
    %c0_i32_0 = arith.constant 0 : i32
    return %arg0, %arg1, %c0_i32 : i32, i32, i32
  }
  func.func @transform_1(%arg0: i32, %arg1: i32) -> (i32, i32, i32) {
    %c0_i32 = arith.constant 0 : i32
    %c0_i32_0 = arith.constant 0 : i32
    %c0_i32_1 = arith.constant 0 : i32
    return %arg0, %c0_i32, %c0_i32_0 : i32, i32, i32
  }
  func.func @transform_2(%arg0: i32, %arg1: i32) -> (i32, i32) {
    %c0_i32 = arith.constant 0 : i32
    %c0_i32_0 = arith.constant 0 : i32
    %c0_i32_1 = arith.constant 0 : i32
    return %c0_i32, %c0_i32_0 : i32, i32
  }
  func.func @transform_3(%arg0: i32, %arg1: i32) -> (i32, i32) {
    %c0_i32 = arith.constant 0 : i32
    %c0_i32_0 = arith.constant 0 : i32
    %c0_i32_1 = arith.constant 0 : i32
    return %c0_i32, %c0_i32_0 : i32, i32
  }
  func.func @transform_4(%arg0: i32, %arg1: i32) -> (i32, i32, i32) {
    %c0_i32 = arith.constant 0 : i32
    %c0_i32_0 = arith.constant 0 : i32
    return %arg0, %arg1, %c0_i32 : i32, i32, i32
  }
}

</mosaic_0001>

<bundles_post_ra>
// kernel: tpu_custom_call.1
= control target key start
LH: loop header
LB: loop body
LE: loop exit
PB: predicated region body
PF: predicated region fallthrough
CT: control target
= control target key end

     0   :  { %s1069_s0 = inlined_call_operand.hbm [shape: bf16[2,16,16], index: 0, kind: input, shape index: {}]   ;;  %s1070_s1 = inlined_call_operand.hbm [shape: f32[2,16,32], index: 1, kind: input, shape index: {}]   ;;  %s1071_s2 = inlined_call_operand.hbm [shape: f32[32,128], index: 2, kind: input, shape index: {}]   ;;  %s1072_s3 = inlined_call_operand.vmem [shape: f32[1,128], index: 3, kind: input, shape index: {}]   ;;  %s1073_s4 = inlined_call_operand.hbm [shape: f32[2,16,128], index: 4, kind: output, shape index: {}]  }
   0x1   :  { %1080 = sst [smem:[#allocation17_spill]] %s1069_s0 }
   0x2   :  { %1081 = sst [smem:[#allocation18_spill]] %s1071_s2 }
   0x3   :  { %9 = vsyncpa [#allocation3], 0 }
   0x4   :  { %11 = vsyncpa [#allocation3 + $0x1], 0 }
   0x5   :  { %12 = vsyncpa [#allocation6], 0 }
   0x6   :  { %14 = vsyncpa [#allocation6 + $0x1], 0 }
   0x7   :  { %15 = vsyncpa [#allocation4], 0 }
   0x8   :  { %17 = vsyncpa [#allocation4 + $0x1], 0  ;;  %s889_s15 = smov 0   ;;  %s891_s16 = smov 0  }
   0x9   :  { %s893_s17 = smov 0   ;;  %s895_s18 = smov 0  }
   0xa   :  { %s897_s19 = smov 0   ;;  %s899_s20 = smov 0  }
   0xb LB: > { %1082 = sst [smem:[#allocation13_spill]] %s843_s17  ;;  %s920_s21 = sadd.s32 4294967295, %s855_s20   ;;  %s855_s20 = sphi %s899_s20, %s23_s20   ;;  %s851_s19 = sphi %s897_s19, %s1103_s19   ;;  %s847_s18 = sphi %s895_s18, %s1102_s18   ;;  %s843_s17 = sphi %s893_s17, %s1098_s17   ;;  %s839_s16 = sphi %s891_s16, %s1101_s16   ;;  %s835_s15 = sphi %s889_s15, %s1100_s15  }
   0xc   : > { %1083 = sst [smem:[#allocation14_spill]] %s855_s20  ;;  %s551_s22 = sadd.s32 4294967294, %s855_s20  }
   0xd   : > { %p57_p0 = scmp.ne.s32.totalorder %s839_s16, %s835_s15  ;;  %p58_p1 = scmp.eq.s32.totalorder %s920_s21, 0 }
   0xe   : > { %p151_p2 = scmp.eq.s32.totalorder %s920_s21, 1  ;;  %p157_p3 = scmp.eq.s32.totalorder %s551_s22, 1 }
   0xf   : > { %p929_p4 = por %p58_p1, %p57_p0  ;;  %p552_p5 = scmp.ge.s32.totalorder %s855_s20, 1 }
  0x10   : > { %p934_p6 = por %p157_p3, %p57_p0  ;;  %p164_p7 = scmp.lt.s32.totalorder %s855_s20, 3 }
  0x11   : > { %s1086_s2 = sld [smem:[#allocation18_spill]]  ;;  %s857_s29 = smov [#allocation7]  }
  0x12   : > { %p942_p8 = pnand %p552_p5, %p164_p7  ;;  %s177_s30 = sshll.u32 %s857_s29, 4  ;;  %s178_s30 = int_to_ptr.vmem [resolvable:$true] %s177_s30 }
  0x13   : > { %p554_p11 = scmp.ge.s32.totalorder %s855_s20, 2  ;;  %s1074_s5 = smov 128  }
  0x14   : > { %p596_p9 = pneg %p942_p8  ;;  %s1075_s6 = smov 8  }
  0x15   : > { %s35_s7 = sadd.s32 1, %s851_s19  ;;  %s44_s8 = sadd.s32 1, %s843_s17 }
  0x16   : > { %p597_p10 = pnand %p596_p9, %p58_p1  ;;  %p37_p12 = scmp.ge.s32.totalorder %s35_s7, 2 }
  0x17   : > { %s175_s27 = sshll.u32 %s1086_s2, 4  ;;  %p51_p13 = scmp.ne.s32.totalorder %s843_s17, %s839_s16  ;;  %s176_s27 = int_to_ptr.hbm [resolvable:$true] %s175_s27 }
  0x18   : > { %599 = dma.hbm_to_vmem [thread:$0]  (!%p597_p10), %s176_s27, 512, %s178_s30, [#allocation6], %s1074_s5, %s1074_s5, %s1075_s6  }
  0x19   : > { %p52_p0 = scmp.eq.s32.totalorder %s855_s20, 0  ;;  %s1105_s7 = smov (%p37_p12, %s35_s7), 0 }
  0x1a   : > { %1088 = sst [smem:[#allocation15_spill]] %s1105_s7  ;;  %p967_p5 = por %p151_p2, %p51_p13 }
  0x1b   : > { %p961_p3 = por %p52_p0, %p51_p13  ;;  %s39_s11 = ssub.s32 %s851_s19, %s1105_s7 }
  0x1c   : > { %p612_p7 = scmp.lt.s32.totalorder %s855_s20, 2  ;;  %p42_p9 = scmp.eq.s32.totalorder %s39_s11, 0 }
  0x1d   : > { %s194_s12 = sand.u32 1, %s843_s17   ;;  %s578_s22 = sshll.u32 %s851_s19, 3 }
  0x1e   : > { %s555_s13 = sshll.u32 %s194_s12, 3  ;;  %s1092_s0 = sld [smem:[#allocation17_spill]] }
  0x1f   : > { %s976_s14 = scalar_select %p42_p9, %s843_s17, %s44_s8  }
  0x20   : > { %s198_s29 = scalar_lea.vmem [#allocation2], %s555_s13  ;;  %p984_p2 = pnand %p612_p7, %p961_p3 }
  0x21   : > { %1091 = sst [smem:[#allocation16_spill]] %s976_s14  ;;  %s208_s30 = sshll.u32 %s198_s29, 4  ;;  %s209_s30 = int_to_ptr.vmem [resolvable:$true] %s208_s30 }
  0x22   : > { %s218_s11 = sand.u32 1, %s855_s20   ;;  %s195_s8 = scalar_lea.sflag [#allocation3], %s194_s12 }
  0x23   : > { %s860_s2 = smov 64   ;;  %s861_s7 = smov 4  }
  0x24   : > { %s205_s27 = scalar_lea.hbm %s1092_s0, %s578_s22  ;;  %s558_s25 = sshll.u32 %s194_s12, 4 }
  0x25   : > { %s206_s5 = sshll.u32 %s205_s27, 4  ;;  %s579_s22 = sshll.u32 %s851_s19, 4  ;;  %s207_s5 = int_to_ptr.hbm [resolvable:$true] %s206_s5 }
  0x26   : > { %603 = dma.hbm_to_vmem [thread:$0]  (!%p984_p2), %s207_s5, 128, %s209_s30, %s195_s8, %s860_s2, %s860_s2, %s861_s7  }
  0x27   : > { %s227_s27 = scalar_lea.hbm %s1070_s1, %s579_s22  ;;  %s222_s29 = scalar_lea.vmem [#allocation5], %s558_s25 }
  0x28   : > { %s230_s9 = sshll.u32 %s222_s29, 4  ;;  %s228_s0 = sshll.u32 %s227_s27, 4  ;;  %s231_s9 = int_to_ptr.vmem [resolvable:$true] %s230_s9  ;;  %s229_s0 = int_to_ptr.hbm [resolvable:$true] %s228_s0 }
  0x29   : > { %s219_s14 = scalar_lea.sflag [#allocation6], %s218_s11  ;;  %s1094_s17 = smov 8  }
  0x2a   : > { %s1095_s20 = smov 128   ;;  %242 = sbr.rel (%p942_p8) target bundleno = 332 (0x14c), region = 36 }
  0x2b   : > { %606 = dma.hbm_to_vmem [thread:$0]  (!%p984_p2), %s229_s0, 256, %s231_s9, %s219_s14, %s1095_s20, %s1095_s20, %s1094_s17  }
  0x2c   : > { %s1003_s2 = sand.u32 (!%p942_p8), 1, %s839_s16  }
  0x2d   : > { %s562_s5 = sshll.u32 (!%p942_p8), %s1003_s2, 3  ;;  %s245_s7 = scalar_lea.sflag (!%p942_p8), [#allocation3], %s1003_s2 }
  0x2e   : > { %s248_s12 = scalar_lea.vmem (!%p942_p8), [#allocation2], %s562_s5 }
  0x2f   : > { %818 = dma.done.wait (%p929_p4), %s245_s7, 128  }
  0x30   : > { %820 = vsyncadd (%p929_p4), %s245_s7, 4294967168  ;;  %s254_s0 = sand.u32 1, %s920_s21   ;;  %s563_s17 = sshll.u32 %s1003_s2, 4 }
  0x31   : > { %s255_s20 = scalar_lea.sflag [#allocation6], %s254_s0  ;;  %s258_s28 = scalar_lea.vmem [#allocation5], %s563_s17 }
  0x32   : > { %822 = dma.done.wait (%p929_p4), %s255_s20, 256  }
  0x33   : > { %824 = vsyncadd (%p929_p4), %s255_s20, 4294967040 }
  0x34   : > { %826 = dma.done.wait (%p58_p1), [#allocation6], 512  }
  0x35   : > { %828 = vsyncadd (%p58_p1), [#allocation6], 4294966784  ;;  %v299_v0 = vld [vmem:[%s258_s28 + $0x8] sm:$0xff]  ;;  %v298_v1 = vld [vmem:[%s258_s28] sm:$0xff]  ;;  %vm305_vm0 = vcmask 130048   ;;  %vm335_vm1 = vcmask 261120  }
  0x36   : > { %v580_v2 = vld [vmem:[%s248_s12] sm:$0xff]  ;;  %323 = vmatpush.msra.mxu0 %v299_v0  ;;  %v332_v7 = vld [vmem:[#allocation7 + $0x8] sm:$0xff]  ;;  %v331_v11 = vld [vmem:[#allocation7] sm:$0xff]  ;;  %s293_s6 = scalar_lea.vmem [#allocation8], %s563_s17  ;;  %s581_s14 = sshll.u32 %s847_s18, 4 }
  0x37   : > { %v296_v3 = vld [vmem:[%s248_s12] sm:$0xff]   ;;  %s427_s8 = scalar_lea.hbm %s1073_s4, %s581_s14  ;;  %s428_s25 = sshll.u32 %s293_s6, 4  ;;  %s429_s25 = int_to_ptr.vmem [resolvable:$true] %s428_s25 }
  0x38   : > { %v334_v4 = vld [vmem:[#allocation7 + $0x18] sm:$0xff]  ;;  %v333_v5 = vld [vmem:[#allocation7 + $0x10] sm:$0xff]  ;;  %v371_v6 = vunpack.c.l.bf16 %v296_v3  ;;  %324 = vmatpush.msra.mxu0 %v298_v1  ;;  %v372_v9 = vunpack.c.h.bf16 %v296_v3  ;;  %s430_s22 = sshll.u32 %s427_s8, 4  ;;  %s414_s18 = scalar_lea.sflag [#allocation4], %s1003_s2  ;;  %s431_s22 = int_to_ptr.hbm [resolvable:$true] %s430_s22 }
  0x39   : > { %354 = vmatpush.msra.mxu1 %v334_v4  ;;  %582 = vmatpush.msra.mxu2 %v334_v4  ;;  %v670_v27 = vld [vmem:[%s1072_s3] ss:$0 sm:$0xff]  ;;  %s779_s13 = sshra.s32 %s431_s22, 4  ;;  %s785_s9 = scalar_lea.hbm %s1073_s4, 32  ;;  %s780_s13 = int_to_ptr.hbm [resolvable:$true] %s779_s13 }
  0x3a   : > { %570 = vmatmul.msk.bf16.vlgmr.msra.gmra.mxu0 %vm305_vm0, %v580_v2  ;;  %v373_v8 = vsel %vm305_vm0, %v371_v6, 0.0  ;;  %v376_v10 = vsel %vm305_vm0, %v372_v9, 0.0  ;;  %s781_s26 = scalar_lea.hbm %s780_s13, 16  ;;  %p786_p10 = scmp.lt.s32.totalorder %s780_s13, %s1073_s4 }
  0x3b   : > { %355 = vmatpush.msra.mxu1 %v333_v5  ;;  %374 = vadd.xlane.f32.xlu0 %v373_v8  ;;  %p782_p1 = scmp.ne.s32.totalorder %s780_s13, %s781_s26  ;;  %p787_p12 = scmp.lt.s32.totalorder %s785_s9, %s781_s26 }
  0x3c   : > { %583 = vmatpush.msra.mxu2 %v333_v5 }
  0x3d   : > { %356 = vmatpush.msra.mxu1 %v332_v7  ;;  %p783_p4 = pnand %p782_p1, %p967_p5  ;;  %p788_p13 = por %p787_p12, %p786_p10 }
  0x3e   : > { %584 = vmatpush.msra.mxu2 %v332_v7 }
  0x3f   : > { %357 = vmatpush.msra.mxu1 %v331_v11  ;;  %p784_p8 = pneg %p783_p4 }
  0x40   : > { %585 = vmatpush.msra.mxu2 %v331_v11 }
  0x41   : > { %p789_p0 = pnand %p788_p13, %p784_p8 }
  0x43   : > { %377 = vadd.xlane.f32.xlu0 %v376_v10 }
  0xae   : > { %v375_v14 = vpop.xlane.xlu0 %374 }
  0xaf   : > { %v379_v15 = vadd.f32 1.0, %v375_v14 }
  0xb1   : > { %671 = vrcp.f32 %v379_v15  ;;  %vm386_vm2 = vweird.f32 %v379_v15  ;;  %v392_v23 = vand.u32 2147483648, %v379_v15  ;;  %v390_v25 = vand.u32 2147483647, %v379_v15 }
  0xb3   : > { %v393_v28 = vor.u32 1.1754944e-38, %v392_v23  ;;  %vm391_vm5 = vcmp.eq.f32.partialorder %v390_v25, 8.507059e+37 }
  0xb6   : > { %v378_v17 = vpop.xlane.xlu0 %377 }
  0xb7   : > { %v326_v12 = vpop.f32.mrf.mxu0  ;;  %v672_v16 = vpop.eup %671  ;;  %v380_v19 = vadd.f32 1.0, %v378_v17 }
  0xb8   : > { %571 = vmatmul.msk.f32.vlgmr.msra.gmra.mxu1 %vm335_vm1, %v326_v12  ;;  %v382_v18 = vmul.f32 %v672_v16, %v379_v15  ;;  %vm387_vm3 = vweird.f32 %v672_v16 }
  0xb9   : > { %673 = vrcp.f32 %v380_v19  ;;  %vm388_vm4 = vmor %vm386_vm2, %vm387_vm3  ;;  %vm400_vm6 = vweird.f32 %v380_v19  ;;  %v406_v36 = vand.u32 2147483648, %v380_v19  ;;  %v404_v38 = vand.u32 2147483647, %v380_v19 }
  0xba   : > { %v383_v20 = vsub.f32 1.0, %v382_v18 }
  0xbb   : > { %v407_v39 = vor.u32 1.1754944e-38, %v406_v36  ;;  %vm405_vm9 = vcmp.eq.f32.partialorder %v404_v38, 8.507059e+37 }
  0xbc   : > { %v384_v21 = vmul.f32 %v672_v16, %v383_v20 }
  0xbe   : > { %v385_v24 = vadd.f32 %v672_v16, %v384_v21 }
  0xbf   : > { %v328_v13 = vpop.f32.mrf.mxu0  ;;  %v674_v22 = vpop.eup %673 }
  0xc0   : > { %572 = vmatmul.msk.f32.vlgmr.msra.gmra.mxu2 %vm335_vm1, %v328_v13  ;;  %v396_v26 = vmul.f32 %v674_v22, %v380_v19  ;;  %v389_v29 = vsel %vm388_vm4, %v672_v16, %v385_v24  ;;  %vm401_vm7 = vweird.f32 %v674_v22 }
  0xc1   : > { %v394_v33 = vsel %vm391_vm5, %v393_v28, %v389_v29  ;;  %vm402_vm8 = vmor %vm400_vm6, %vm401_vm7 }
  0xc2   : > { %v397_v31 = vsub.f32 1.0, %v396_v26 }
  0xc4   : > { %v398_v35 = vmul.f32 %v674_v22, %v397_v31 }
  0xc6   : > { %v399_v37 = vadd.f32 %v674_v22, %v398_v35 }
  0xc8   : > { %v403_v40 = vsel %vm402_vm8, %v674_v22, %v399_v37 }
  0xc9   : > { %v408_v43 = vsel %vm405_vm9, %v407_v39, %v403_v40 }
 0x135   : > { %v359_v30 = vpop.f32.mrf.mxu1 }
 0x136   : > { %v369_v32 = vadd.f32 %v670_v27, %v359_v30 }
 0x138   : > { %v409_v34 = vmul.f32 %v394_v33, %v369_v32 }
 0x13a   : > { %411 = vst [vmem:[%s293_s6] sm:$0xff] %v409_v34 }
 0x143   : > { %v362_v41 = vpop.f32.mrf.mxu2 }
 0x144   : > { %v370_v42 = vadd.f32 %v670_v27, %v362_v41 }
 0x146   : > { %v410_v44 = vmul.f32 %v408_v43, %v370_v42 }
 0x148   : > { %412 = vst [vmem:[%s293_s6 + $0x8] sm:$0xff] %v410_v44 }
 0x149   : > { %792 = shalt.err (!%p789_p0)
}
 0x14a   : > { %s862_s2 = smov 128   ;;  %s863_s12 = smov 8  }
 0x14b   : > { %594 = dma.vmem_to_hbm [thread:$0]  (%p967_p5), %s429_s25, 256, %s431_s22, %s414_s18, %s862_s2, %s862_s2, %s863_s12  }
 0x14c PF: > { %s1096_s0 = sld [smem:[#allocation14_spill]]  ;;  %s445_s17 = sand.u32 1, %s835_s15  }
 0x14d   : > { %p608_p3 = pnand %p554_p11, %p934_p6  ;;  %s446_s20 = scalar_lea.sflag [#allocation4], %s445_s17 }
 0x14f   : > { %p609_p7 = pneg %p608_p3 }
 0x151   : > { %830 = dma.done.wait (%p609_p7), %s446_s20, 256  }
 0x152   : > { %832 = vsyncadd (%p609_p7), %s446_s20, 4294967040  ;;  %s23_s20 = sadd.s32 1, %s1096_s0   ;;  %s1097_s28 = sld [smem:[#allocation13_spill]] }
 0x153   : > { %p20_p9 = scmp.ge.s32.totalorder %s23_s20, 4   ;;  %s1098_s17 = sld [smem:[#allocation16_spill]] }
 0x154   : > { %s1099_s10 = sld [smem:[#allocation15_spill]]  ;;  %s1100_s15 = smov %s839_s16 }
 0x155   : > { %s1102_s18 = smov %s851_s19 }
 0x156   :  { %22 = sbr.rel (!%p20_p9) target bundleno = 11 (0xb), region = 98 }
 0x158   : > { %s1101_s16 = smov %s1097_s28 }
 0x15a   : > { %s1103_s19 = smov %s1099_s10 }
 0x15b   :  { %452 = vsyncpa [#allocation3], 1 }
 0x15c   :  { %454 = vsyncpa [#allocation3 + $0x1], 1 }
 0x15d   :  { %455 = vsyncpa [#allocation6], 1 }
 0x15e   :  { %457 = vsyncpa [#allocation6 + $0x1], 1 }
 0x15f   :  { %458 = vsyncpa [#allocation4], 1 }
 0x160   :  { %460 = vsyncpa [#allocation4 + $0x1], 1 }

</bundles_post_ra>
